<compile_context>
chip_gen: v7x
topology: tpu7x:2x2x1
jax: 0.10.0
libtpu: 0.0.40
codegen_flags: <defaults>
</compile_context>

<pallas_src>
import functools
import math

import jax
import jax.numpy as jnp
from jax.experimental import pallas as pl
from jax.experimental.pallas import tpu as pltpu


def _round_up(x, m):
    return (x + m - 1) // m * m


def _vmem_config():
    """(vmem_limit_bytes, per-step tile budget) tuned per TPU generation."""
    phys = None
    try:
        phys = int(pltpu.get_tpu_info().vmem_capacity_bytes)
    except Exception:
        phys = None
    if phys is not None and phys > 64 * 1024 * 1024:
        # v5e / v6e: 128 MiB physical VMEM -> raise scoped limit, big tiles.
        return 64 * 1024 * 1024, 28 * 1024 * 1024
    # v7x (64 MiB physical) or unknown -> leave headroom.
    return 48 * 1024 * 1024, 20 * 1024 * 1024


def _nll_tile(loc, scale, tgt, eps):
    loc = loc.astype(jnp.float32)
    tgt = tgt.astype(jnp.float32)
    scale = jnp.maximum(scale.astype(jnp.float32), jnp.float32(eps))  # clamp_(min=eps)
    return jnp.log(2.0 * scale) + jnp.abs(tgt - loc) / scale


def _mask_oob_rows(nll, n_rows, row_tile, tiles_per_split):
    """Zero rows whose global index is >= n_rows (ragged / duplicated tiles)."""
    rows = nll.shape[0]
    start = (pl.program_id(0) * tiles_per_split + pl.program_id(1)) * row_tile
    row_ids = start + jax.lax.broadcasted_iota(jnp.int32, (rows, 1), 0)
    return jnp.where(row_ids < n_rows, nll, 0.0)


def _accumulate(nll, out_ref, acc_ref):
    """(8, D) sublane-shaped running partial; cross-sublane reduce left to wrapper."""
    i = pl.program_id(1)

    @pl.when(i == 0)
    def _():
        acc_ref[...] = jnp.zeros_like(acc_ref)

    r, d = nll.shape
    # Reduce only the leading (cross-vreg) axis: pure VPU adds, no XLU work.
    acc_ref[...] += jnp.sum(nll.reshape(r // 8, 8, d), axis=0)

    @pl.when(i == pl.num_programs(1) - 1)
    def _():
        out_ref[0] = acc_ref[...]


def _sum_kernel_split(loc_ref, scale_ref, tgt_ref, out_ref, acc_ref, *,
                      eps, n_rows, row_tile, tiles_per_split, needs_mask):
    nll = _nll_tile(loc_ref[...], scale_ref[...], tgt_ref[...], eps)
    if needs_mask:
        nll = _mask_oob_rows(nll, n_rows, row_tile, tiles_per_split)
    _accumulate(nll, out_ref, acc_ref)


def _sum_kernel_fused(pred_ref, tgt_ref, out_ref, acc_ref, *,
                      d, eps, n_rows, row_tile, tiles_per_split, needs_mask):
    pred = pred_ref[...]
    nll = _nll_tile(pred[:, :d], pred[:, d:], tgt_ref[...], eps)
    if needs_mask:
        nll = _mask_oob_rows(nll, n_rows, row_tile, tiles_per_split)
    _accumulate(nll, out_ref, acc_ref)


def _none_kernel_split(loc_ref, scale_ref, tgt_ref, out_ref, *, eps):
    out_ref[...] = _nll_tile(loc_ref[...], scale_ref[...], tgt_ref[...], eps
                             ).astype(out_ref.dtype)


def _none_kernel_fused(pred_ref, tgt_ref, out_ref, *, d, eps):
    pred = pred_ref[...]
    out_ref[...] = _nll_tile(pred[:, :d], pred[:, d:], tgt_ref[...], eps
                             ).astype(out_ref.dtype)


def laplace_nll_loss(pred, target, eps=1e-6, reduction="mean",
                     row_tile=None, num_splits=1, core_parallel=False):
    """Pallas implementation of LaplaceNLLLoss.forward ('mean'/'sum'/'none').

    Defaults (num_splits=1) are tuned for the single-TensorCore v5e/v6e parts.
    On v7x pass num_splits=2, core_parallel=True to shard the reduction over
    both TensorCores.
    """
    # TODO(synk): auto-detect 2-TC (v7x) chips and default to num_splits=2 +
    # pltpu.CORE_PARALLEL once the TpuInfo core-count query is available.
    if reduction not in ("mean", "sum", "none"):
        raise ValueError("{} is not a valid value for reduction".format(reduction))

    *lead, two_d = pred.shape
    d = two_d // 2
    assert two_d == 2 * d
    assert tuple(target.shape) == tuple(lead) + (d,)

    n = math.prod(lead) if lead else 1
    pred2 = pred.reshape(n, two_d)
    tgt2 = target.reshape(n, d)
    out_dtype = jnp.result_type(pred.dtype, target.dtype)

    vmem_limit, tile_budget = _vmem_config()

    # dtype-dependent sublane multiple (8 for f32, 16 for bf16, 32 for 8-bit).
    min_item = min(pred2.dtype.itemsize, tgt2.dtype.itemsize,
                   jnp.dtype(out_dtype).itemsize)
    sub = max(8, 32 // max(min_item, 1))

    # Per-step working set: loc + scale + target (and the output tile for
    # 'none'), double-buffered by the pipeline.
    bytes_per_row = 2 * d * pred2.dtype.itemsize + d * tgt2.dtype.itemsize
    if reduction == "none":
        bytes_per_row += d * jnp.dtype(out_dtype).itemsize
    max_rows = max(sub, (tile_budget // (2 * bytes_per_row)) // sub * sub)

    if row_tile is None:
        row_tile = 2048                       # amortize ~0.35us per-step overhead
    row_tile = min(row_tile, max_rows, _round_up(n, sub))
    row_tile = max(sub, row_tile // sub * sub)

    lane_split = (d % 128 == 0)   # loc/scale split expressible as lane-aligned blocks
    total_tiles = -(-n // row_tile)

    if reduction in ("mean", "sum"):
        num_splits = max(1, min(int(num_splits), total_tiles))
        tiles_per_split = -(-total_tiles // num_splits)
        last_block = total_tiles - 1
        needs_mask = (n % row_tile != 0) or (num_splits * tiles_per_split != total_tiles)

        def row_block(c, i):
            # Clamp so duplicated/overhanging tiles re-read a valid block; their
            # rows are zeroed by the in-kernel mask before accumulation.
            return jnp.minimum(c * tiles_per_split + i, last_block)

        tgt_spec = pl.BlockSpec((row_tile, d), lambda c, i: (row_block(c, i), 0))
        common = dict(eps=eps, n_rows=n, row_tile=row_tile,
                      tiles_per_split=tiles_per_split, needs_mask=needs_mask)
        if lane_split:
            kernel = functools.partial(_sum_kernel_split, **common)
            in_specs = [
                pl.BlockSpec((row_tile, d), lambda c, i: (row_block(c, i), 0)),  # loc
                pl.BlockSpec((row_tile, d), lambda c, i: (row_block(c, i), 1)),  # scale
                tgt_spec,
            ]
            operands = (pred2, pred2, tgt2)
        else:
            kernel = functools.partial(_sum_kernel_fused, d=d, **common)
            in_specs = [
                pl.BlockSpec((row_tile, two_d), lambda c, i: (row_block(c, i), 0)),
                tgt_spec,
            ]
            operands = (pred2, tgt2)

        lead_sem = pltpu.CORE_PARALLEL if core_parallel else "parallel"
        cost = pl.CostEstimate(
            flops=6 * n * d,
            transcendentals=2 * n * d,
            bytes_accessed=n * (2 * d * pred2.dtype.itemsize + d * tgt2.dtype.itemsize)
                           + num_splits * 8 * d * 4)

        partials = pl.pallas_call(
            kernel,
            out_shape=jax.ShapeDtypeStruct((num_splits, 8, d), jnp.float32),
            grid_spec=pltpu.PrefetchScalarGridSpec(
                num_scalar_prefetch=0,
                grid=(num_splits, tiles_per_split),
                in_specs=in_specs,
                out_specs=pl.BlockSpec((1, 8, d), lambda c, i: (c, 0, 0)),
                scratch_shapes=[pltpu.VMEM((8, d), jnp.float32)],
            ),
            compiler_params=pltpu.CompilerParams(
                dimension_semantics=(lead_sem, "arbitrary"),
                vmem_limit_bytes=vmem_limit),
            cost_estimate=cost,
        )(*operands)

        total = jnp.sum(partials, dtype=jnp.float32)
        if reduction == "mean":
            total = total / jnp.float32(n * d)
        return total.astype(out_dtype)

    # reduction == "none": exact-size output, ragged last tile handled by
    # Pallas' masked partial-block writes (no padding, no post-kernel slice).
    tgt_spec = pl.BlockSpec((row_tile, d), lambda i: (i, 0))
    if lane_split:
        kernel = functools.partial(_none_kernel_split, eps=eps)
        in_specs = [
            pl.BlockSpec((row_tile, d), lambda i: (i, 0)),
            pl.BlockSpec((row_tile, d), lambda i: (i, 1)),
            tgt_spec,
        ]
        operands = (pred2, pred2, tgt2)
    else:
        kernel = functools.partial(_none_kernel_fused, d=d, eps=eps)
        in_specs = [
            pl.BlockSpec((row_tile, two_d), lambda i: (i, 0)),
            tgt_spec,
        ]
        operands = (pred2, tgt2)

    cost = pl.CostEstimate(
        flops=6 * n * d,
        transcendentals=2 * n * d,
        bytes_accessed=n * (2 * d * pred2.dtype.itemsize + d * tgt2.dtype.itemsize
                            + d * jnp.dtype(out_dtype).itemsize))

    nll = pl.pallas_call(
        kernel,
        out_shape=jax.ShapeDtypeStruct((n, d), out_dtype),
        grid_spec=pltpu.PrefetchScalarGridSpec(
            num_scalar_prefetch=0,
            grid=(total_tiles,),
            in_specs=in_specs,
            out_specs=pl.BlockSpec((row_tile, d), lambda i: (i, 0)),
        ),
        compiler_params=pltpu.CompilerParams(
            dimension_semantics=("parallel",),
            vmem_limit_bytes=vmem_limit),
        cost_estimate=cost,
    )(*operands)
    return nll.reshape(tuple(lead) + (d,))


def _laplace_nll_ref(pred, target, eps=1e-6, reduction="mean"):
    d = pred.shape[-1] // 2
    loc, scale = pred[..., :d], pred[..., d:]
    scale = jnp.maximum(scale, eps)
    nll = jnp.log(2.0 * scale) + jnp.abs(target - loc) / scale
    if reduction == "mean":
        return jnp.mean(nll)
    if reduction == "sum":
        return jnp.sum(nll)
    return nll


if __name__ == "__main__":
    key = jax.random.PRNGKey(0)
    k1, k2, k3, k4 = jax.random.split(key, 4)

    # Case A: d = 64 (2*d = 128) -> fused in-kernel loc/scale split path.
    batch, seq, d = 2, 8, 64
    pred_a = jax.random.normal(k1, (batch, seq, 2 * d), dtype=jnp.float32)
    tgt_a = jax.random.normal(k2, (batch, seq, d), dtype=jnp.float32)

    # Case B: d = 128, N = 111 rows (ragged last tile) -> BlockSpec-split path.
    batch_b, seq_b, d_b = 3, 37, 128
    pred_b = jax.random.normal(k3, (batch_b, seq_b, 2 * d_b), dtype=jnp.float32)
    tgt_b = jax.random.normal(k4, (batch_b, seq_b, d_b), dtype=jnp.float32)

    checks = [
        (pred_a, tgt_a, "mean"),
        (pred_a, tgt_a, "sum"),
        (pred_a, tgt_a, "none"),
        (pred_b, tgt_b, "mean"),
        (pred_b, tgt_b, "sum"),
        (pred_b, tgt_b, "none"),
    ]
    for p, t, red in checks:
        out = jax.block_until_ready(laplace_nll_loss(p, t, reduction=red))
        ref = _laplace_nll_ref(p, t, reduction=red)
        assert out.dtype == ref.dtype, (red, out.dtype, ref.dtype)
        assert jnp.allclose(out, ref, rtol=1e-5, atol=1e-5), (red, out, ref)

    # Case C: bf16 in -> bf16 out for 'none' (output matches input dtype).
    pred_c = pred_b.astype(jnp.bfloat16)
    tgt_c = tgt_b.astype(jnp.bfloat16)
    out_c = jax.block_until_ready(laplace_nll_loss(pred_c, tgt_c, reduction="none"))
    ref_c = _laplace_nll_ref(pred_c.astype(jnp.float32), tgt_c.astype(jnp.float32),
                             reduction="none")
    assert out_c.dtype == jnp.bfloat16, out_c.dtype
    assert jnp.allclose(out_c.astype(jnp.float32), ref_c, rtol=2e-2, atol=2e-2)

    print("KERNEL_OK")
</pallas_src>

<mosaic_0001>
module attributes {stable_mosaic.version = 11 : i64} {
  func.func @_sum_kernel_fused(%arg0: i32, %arg1: i32, %arg2: memref<16x128xf32, #tpu.memory_space<vmem>>, %arg3: memref<16x64xf32, #tpu.memory_space<vmem>>, %arg4: memref<1x8x64xf32, #tpu.memory_space<vmem>>, %arg5: memref<8x64xf32, #tpu.memory_space<vmem>>) attributes {dimension_semantics = [#tpu.dimension_semantics<parallel>, #tpu.dimension_semantics<arbitrary>], iteration_bounds = array<i64: 1, 1>, scalar_prefetch = 0 : i64, scratch_operands = 1 : i64, tpu.core_type = #tpu.core_type<tc>, window_params = [{transform_indices = @transform_0, window_bounds = array<i64: 16, 128>}, {transform_indices = @transform_1, window_bounds = array<i64: 16, 64>}, {transform_indices = @transform_2, window_bounds = array<i64: 1, 8, 64>}]} {
    %c0 = arith.constant 0 : index
    %c0_0 = arith.constant 0 : index
    %0 = vector.load %arg2[%c0, %c0_0] : memref<16x128xf32, #tpu.memory_space<vmem>>, vector<16x128xf32>
    %1 = vector.extract_strided_slice %0 {offsets = [0, 0], sizes = [16, 64], strides = [1, 1]} : vector<16x128xf32> to vector<16x64xf32>
    %2 = vector.extract_strided_slice %0 {offsets = [0, 64], sizes = [16, 64], strides = [1, 1]} : vector<16x128xf32> to vector<16x64xf32>
    %c0_1 = arith.constant 0 : index
    %c0_2 = arith.constant 0 : index
    %3 = vector.load %arg3[%c0_1, %c0_2] : memref<16x64xf32, #tpu.memory_space<vmem>>, vector<16x64xf32>
    %cst = arith.constant 9.99999997E-7 : f32
    %4 = vector.broadcast %cst : f32 to vector<16x64xf32>
    %5 = arith.maximumf %2, %4 : vector<16x64xf32>
    %cst_3 = arith.constant 2.000000e+00 : f32
    %6 = vector.broadcast %cst_3 : f32 to vector<16x64xf32>
    %7 = arith.mulf %6, %5 : vector<16x64xf32>
    %8 = math.log %7 : vector<16x64xf32>
    %9 = arith.subf %3, %1 : vector<16x64xf32>
    %10 = math.absf %9 : vector<16x64xf32>
    %11 = arith.divf %10, %5 : vector<16x64xf32>
    %12 = arith.addf %8, %11 : vector<16x64xf32>
    %c0_i32 = arith.constant 0 : i32
    %13 = arith.cmpi eq, %arg1, %c0_i32 : i32
    %14 = arith.extui %13 : i1 to i32
    %c0_i32_4 = arith.constant 0 : i32
    %15 = arith.cmpi ne, %14, %c0_i32_4 : i32
    scf.if %15 {
      %cst_12 = arith.constant 0.000000e+00 : f32
      %24 = vector.broadcast %cst_12 : f32 to vector<8x64xf32>
      %c0_13 = arith.constant 0 : index
      %c0_14 = arith.constant 0 : index
      %25 = vector.load %arg5[%c0_13, %c0_14] : memref<8x64xf32, #tpu.memory_space<vmem>>, vector<8x64xf32>
      tpu.vector_store %arg5[%c0_13, %c0_14], %24 {strides = array<i32>} : memref<8x64xf32, #tpu.memory_space<vmem>>, vector<8x64xf32>,
    } else {
    }
    %c0_5 = arith.constant 0 : index
    %c0_6 = arith.constant 0 : index
    %16 = vector.load %arg5[%c0_5, %c0_6] : memref<8x64xf32, #tpu.memory_space<vmem>>, vector<8x64xf32>
    %17 = vector.shape_cast %12 : vector<16x64xf32> to vector<2x8x64xf32>
    %cst_7 = arith.constant dense<0.000000e+00> : vector<8x64xf32>
    %18 = vector.multi_reduction <add>, %17, %cst_7 [0] : vector<2x8x64xf32> to vector<8x64xf32>
    %19 = arith.addf %16, %18 : vector<8x64xf32>
    %c0_8 = arith.constant 0 : index
    %c0_9 = arith.constant 0 : index
    %20 = vector.load %arg5[%c0_8, %c0_9] : memref<8x64xf32, #tpu.memory_space<vmem>>, vector<8x64xf32>
    tpu.vector_store %arg5[%c0_8, %c0_9], %19 {strides = array<i32>} : memref<8x64xf32, #tpu.memory_space<vmem>>, vector<8x64xf32>,
    %c0_i32_10 = arith.constant 0 : i32
    %21 = arith.cmpi eq, %arg1, %c0_i32_10 : i32
    %22 = arith.extui %21 : i1 to i32
    %c0_i32_11 = arith.constant 0 : i32
    %23 = arith.cmpi ne, %22, %c0_i32_11 : i32
    scf.if %23 {
      %c0_12 = arith.constant 0 : index
      %c0_13 = arith.constant 0 : index
      %24 = vector.load %arg5[%c0_12, %c0_13] : memref<8x64xf32, #tpu.memory_space<vmem>>, vector<8x64xf32>
      %c0_14 = arith.constant 0 : index
      %c0_15 = arith.constant 0 : index
      %c0_16 = arith.constant 0 : index
      %25 = vector.load %arg4[%c0_14, %c0_15, %c0_16] : memref<1x8x64xf32, #tpu.memory_space<vmem>>, vector<1x8x64xf32>
      %26 = vector.shape_cast %25 : vector<1x8x64xf32> to vector<8x64xf32>
      %27 = vector.shape_cast %24 : vector<8x64xf32> to vector<1x8x64xf32>
      tpu.vector_store %arg4[%c0_14, %c0_15, %c0_16], %27 {strides = array<i32>} : memref<1x8x64xf32, #tpu.memory_space<vmem>>, vector<1x8x64xf32>,
    } else {
    }
    return
  }
  func.func @transform_0(%arg0: i32, %arg1: i32) -> (i32, i32) {
    %c1_i32 = arith.constant 1 : i32
    %0 = arith.muli %arg0, %c1_i32 : i32
    %1 = arith.addi %0, %arg1 : i32
    %c0_i32 = arith.constant 0 : i32
    %2 = arith.minsi %1, %c0_i32 : i32
    %c0_i32_0 = arith.constant 0 : i32
    %c0_i32_1 = arith.constant 0 : i32
    return %2, %c0_i32_0 : i32, i32
  }
  func.func @transform_1(%arg0: i32, %arg1: i32) -> (i32, i32) {
    %c1_i32 = arith.constant 1 : i32
    %0 = arith.muli %arg0, %c1_i32 : i32
    %1 = arith.addi %0, %arg1 : i32
    %c0_i32 = arith.constant 0 : i32
    %2 = arith.minsi %1, %c0_i32 : i32
    %c0_i32_0 = arith.constant 0 : i32
    %c0_i32_1 = arith.constant 0 : i32
    return %2, %c0_i32_0 : i32, i32
  }
  func.func @transform_2(%arg0: i32, %arg1: i32) -> (i32, i32, i32) {
    %c0_i32 = arith.constant 0 : i32
    %c0_i32_0 = arith.constant 0 : i32
    %c0_i32_1 = arith.constant 0 : i32
    return %arg0, %c0_i32, %c0_i32_0 : i32, i32, i32
  }
}

</mosaic_0001>

<bundles_post_ra>
// kernel: tpu_custom_call.1
= control target key start
LH: loop header
LB: loop body
LE: loop exit
PB: predicated region body
PF: predicated region fallthrough
CT: control target
= control target key end

     0   :  { %7 = vsyncpa [#allocation4], 0  ;;  %s294_s0 = inlined_call_operand.hbm [shape: f32[16,128], index: 0, kind: input, shape index: {}]   ;;  %s295_s1 = inlined_call_operand.hbm [shape: f32[16,64], index: 1, kind: input, shape index: {}]   ;;  %s296_s2 = inlined_call_operand.hbm [shape: f32[1,8,64], index: 2, kind: output, shape index: {}]  }
   0x1   :  { %8 = vsyncpa [#allocation7], 0 }
   0x2   :  { %9 = vsyncpa [#allocation5], 0  ;;  %s228_s9 = smov [#allocation3]   ;;  %s156_s13 = scalar_lea.hbm %s294_s0, 256 }
   0x3   :  { %s21_s10 = sshll.u32 %s228_s9, 4  ;;  %p157_p0 = scmp.ne.s32.totalorder %s294_s0, %s156_s13  ;;  %s22_s10 = int_to_ptr.vmem [resolvable:$true] %s21_s10 }
   0x4   :  { %p160_p1 = scmp.lt.u32.totalorder %s156_s13, %s294_s0 }
   0x6   :  { %p162_p2 = pnand %p160_p1, %p157_p0 }
   0x8   :  { %165 = shalt.err (!%p162_p2)
}
   0x9   :  { %s166_s18 = scalar_lea.vmem %s22_s10, 256  ;;  %p171_p4 = scmp.lt.s32.totalorder %s22_s10, %s22_s10 }
   0xa   :  { %p167_p3 = scmp.ne.s32.totalorder %s22_s10, %s166_s18  ;;  %p172_p5 = scmp.lt.s32.totalorder %s166_s18, %s166_s18 }
   0xc   :  { %p173_p6 = por %p172_p5, %p171_p4 }
   0xe   :  { %p174_p7 = pnand %p173_p6, %p167_p3 }
  0x10   :  { %177 = shalt.err (!%p174_p7)
}
  0x11   :  { %s229_s19 = smov 128   ;;  %s230_s20 = smov 8  }
  0x12   :  { %27 = dma.hbm_to_vmem [thread:$0]  %s294_s0, 256, %s22_s10, [#allocation4], %s229_s19, %s229_s19, %s230_s20  }
  0x13   :  { %s231_s23 = smov [#allocation6]   ;;  %s178_s27 = scalar_lea.hbm %s295_s1, 256 }
  0x14   :  { %s39_s24 = sshll.u32 %s231_s23, 4  ;;  %p179_p8 = scmp.ne.s32.totalorder %s295_s1, %s178_s27  ;;  %s40_s24 = int_to_ptr.vmem [resolvable:$true] %s39_s24 }
  0x15   :  { %p182_p9 = scmp.lt.u32.totalorder %s178_s27, %s295_s1 }
  0x17   :  { %p184_p10 = pnand %p182_p9, %p179_p8 }
  0x19   :  { %187 = shalt.err (!%p184_p10)
}
  0x1a   :  { %s188_s4 = scalar_lea.vmem %s40_s24, 256  ;;  %p193_p12 = scmp.lt.s32.totalorder %s40_s24, %s40_s24 }
  0x1b   :  { %p189_p11 = scmp.ne.s32.totalorder %s40_s24, %s188_s4  ;;  %p194_p13 = scmp.lt.s32.totalorder %s188_s4, %s188_s4 }
  0x1d   :  { %p195_p0 = por %p194_p13, %p193_p12 }
  0x1f   :  { %p196_p1 = pnand %p195_p0, %p189_p11 }
  0x21   :  { %199 = shalt.err (!%p196_p1)
}
  0x22   :  { %45 = dma.hbm_to_vmem [thread:$0]  %s295_s1, 256, %s40_s24, [#allocation7], %s229_s19, %s229_s19, %s230_s20  }
  0x23   :  { %222 = dma.done.wait [#allocation4], 256  }
  0x24   :  { %223 = vsyncadd [#allocation4], 4294967040 }
  0x25   :  { %224 = dma.done.wait [#allocation7], 256  }
  0x26   :  { %225 = vsyncadd [#allocation7], 4294967040  ;;  %v60_v0 = vld [vmem:[#allocation3] sm:$0xff]  ;;  %v61_v1 = vld [vmem:[#allocation3 + $0x8] sm:$0xff]  ;;  %s232_s6 = smov 64   ;;  %vm102_vm0 = vcmask 523264  }
  0x27   :  { %v64_v2 = vmax.f32 %v60_v0, 1e-06  ;;  %v65_v3 = vmax.f32 %v61_v1, 1e-06  ;;  %v62_v5 = vld [vmem:[#allocation6] sm:$0xff]  ;;  %v63_v8 = vld [vmem:[#allocation6 + $0x8] sm:$0xff] }
  0x28   :  { %v72_v6 = vsub.f32 %v62_v5, %v60_v0  ;;  %v73_v9 = vsub.f32 %v63_v8, %v61_v1  ;;  %v233_v12 = vmov 0.0   ;;  %vm105_vm1 = vcmask 1048064   ;;  %s234_s1 = smov [#allocation8]  }
  0x29   :  { %78 = vrot.lane.b32.xlu0 %v64_v2, %s232_s6  ;;  %103 = vst.msk [vmem:[#allocation2] sm:$0xff] %vm102_vm0, %v233_v12  ;;  %v66_v17 = vmul.f32 2.0, %v64_v2  ;;  %v67_v18 = vmul.f32 2.0, %v65_v3  ;;  %s127_s7 = sshll.u32 %s234_s1, 4  ;;  %s128_s7 = int_to_ptr.vmem [resolvable:$true] %s127_s7 }
  0x2a   :  { %v74_v10 = vand.u32 2147483647, %v72_v6  ;;  %v75_v14 = vand.u32 2147483647, %v73_v9  ;;  %s200_s8 = scalar_lea.vmem %s128_s7, 128  ;;  %p205_p3 = scmp.lt.s32.totalorder %s128_s7, %s128_s7 }
  0x2b   :  { %p201_p2 = scmp.ne.s32.totalorder %s128_s7, %s200_s8  ;;  %p206_p4 = scmp.lt.s32.totalorder %s200_s8, %s200_s8 }
  0x2d   :  { %80 = vrot.lane.b32.xlu0 %v65_v3, %s232_s6  ;;  %p207_p5 = por %p206_p4, %p205_p3 }
  0x2f   :  { %p208_p6 = pnand %p207_p5, %p201_p2 }
  0x30   :  { %v104_v30 = vld [vmem:[#allocation2] sm:$0xff] }
  0x9b   :  { %v79_v4 = vpop.permute.xlu0 %78 }
  0x9c   :  { %148 = vrcp.f32 %v79_v4 }
  0x9f   :  { %v81_v7 = vpop.permute.xlu0 %80 }
  0xa0   :  { %150 = vrcp.f32 %v81_v7 }
  0xa1   :  { %152 = vlog2.f32 %v66_v17 }
  0xa2   :  { %154 = vlog2.f32 %v67_v18 }
  0xa6   :  { %v149_v11 = vpop.eup %148 }
  0xa7   :  { %v85_v13 = vmul.f32 %v149_v11, %v74_v10 }
  0xa9   :  { %90 = vrot.lane.b32.xlu1 %v85_v13, %s232_s6 }
  0xaa   :  { %v151_v15 = vpop.eup %150 }
  0xab   :  { %v87_v16 = vmul.f32 %v151_v15, %v75_v14  ;;  %v153_v19 = vpop.eup %152 }
  0xac   :  { %v155_v20 = vpop.eup %154  ;;  %v69_v21 = vmul.f32 0.6931472, %v153_v19 }
  0xad   :  { %92 = vrot.lane.b32.xlu1 %v87_v16, %s232_s6  ;;  %v71_v23 = vmul.f32 0.6931472, %v155_v20 }
 0x11b   :  { %v91_v22 = vpop.permute.xlu1 %90 }
 0x11c   :  { %v96_v24 = vadd.f32 %v91_v22, %v69_v21 }
 0x11e   :  { %v106_v27 = vsel %vm105_vm1, %v96_v24, 0.0 }
 0x11f   :  { %v93_v25 = vpop.permute.xlu1 %92 }
 0x120   :  { %v97_v26 = vadd.f32 %v93_v25, %v71_v23 }
 0x122   :  { %v107_v28 = vsel %vm105_vm1, %v97_v26, 0.0 }
 0x123   :  { %v108_v29 = vadd.f32 %v107_v28, %v106_v27 }
 0x125   :  { %110 = vrot.lane.b32.xlu0 %v108_v29, %s232_s6 }
 0x197   :  { %v111_v31 = vpop.permute.xlu0 %110 }
 0x198   :  { %v113_v32 = vadd.f32 %v111_v31, %v104_v30 }
 0x19a   :  { %115 = vst.msk [vmem:[#allocation2] sm:$0xff] %vm102_vm0, %v113_v32 }
 0x1a1   :  { %v119_v33 = vld [vmem:[#allocation2] sm:$0xff] }
 0x1a2   :  { %120 = vst.msk [vmem:[#allocation8] sm:$0xff] %vm102_vm0, %v119_v33 }
 0x1a3   :  { %211 = shalt.err (!%p208_p6)
}
 0x1a4   :  { %s212_s11 = scalar_lea.hbm %s296_s2, 128 }
 0x1a5   :  { %p213_p7 = scmp.ne.s32.totalorder %s296_s2, %s212_s11  ;;  %p216_p8 = scmp.lt.u32.totalorder %s212_s11, %s296_s2 }
 0x1a7   :  { %p218_p9 = pnand %p216_p8, %p213_p7 }
 0x1a9   :  { %221 = shalt.err (!%p218_p9)
}
 0x1aa   :  { %130 = dma.vmem_to_hbm [thread:$0]  %s128_s7, 128, %s296_s2, [#allocation5]  }
 0x1ab   :  { %226 = dma.done.wait [#allocation5], 128  }
 0x1ac   :  { %227 = vsyncadd [#allocation5], 4294967168 }
 0x1ad   :  { %134 = vsyncpa [#allocation4], 1 }
 0x1ae   :  { %135 = vsyncpa [#allocation7], 1 }
 0x1af   :  { %136 = vsyncpa [#allocation5], 1 }

</bundles_post_ra>
